<compile_context>
chip_gen: v7x
topology: tpu7x:2x2x1
jax: 0.10.0
libtpu: 0.0.40
codegen_flags: <defaults>
</compile_context>

<pallas_src>
import functools
import jax
import jax.numpy as jnp
from jax.experimental import pallas as pl
from jax.experimental.pallas import tpu as pltpu


# ------------------------------ helpers --------------------------------------

def _round_up(x, m):
    return (x + m - 1) // m * m


def _pad2(a, rows, cols):
    r, c = a.shape
    if r == rows and c == cols:
        return a
    return jnp.pad(a, ((0, rows - r), (0, cols - c)))


# ------------------------- tiled GEMM (+fused epilogue) -----------------------

def _linear_kernel(*refs, act, has_bias, has_res):
    # refs: x, w, [bias], [residual], out, acc_scratch
    x_ref, w_ref = refs[0], refs[1]
    idx = 2
    b_ref = None
    r_ref = None
    if has_bias:
        b_ref = refs[idx]; idx += 1
    if has_res:
        r_ref = refs[idx]; idx += 1
    o_ref = refs[idx]
    acc_ref = refs[idx + 1]

    k = pl.program_id(2)

    @pl.when(k == 0)
    def _():
        acc_ref[...] = jnp.zeros_like(acc_ref)

    acc_ref[...] += jnp.dot(x_ref[...], w_ref[...],
                            preferred_element_type=jnp.float32)

    @pl.when(k == pl.num_programs(2) - 1)
    def _():
        y = acc_ref[...]
        if has_bias:
            y = y + b_ref[...]
        if act == "quick_gelu":          # CLIP quick_gelu: x * sigmoid(1.702 x)
            y = y * jax.nn.sigmoid(1.702 * y)
        if has_res:
            y = y + r_ref[...]
        o_ref[...] = y


def linear(x, w, b=None, act=None, residual=None, tm=256, tn=256, tk=512):
    """x: [M, K] (any float), w: [K, N] -> [M, N] float32.

    bf16 MXU inputs, f32 accumulation.  Optional fused bias / quick_gelu /
    residual-add epilogue.  Tiles sized for v7x's 64 MiB VMEM; v6e can go
    larger.
    """
    M, K = x.shape
    N = w.shape[1]
    tm_ = min(tm, _round_up(M, 8))
    tn_ = min(tn, _round_up(N, 128))
    tk_ = min(tk, _round_up(K, 128))
    Mp, Kp, Np = _round_up(M, tm_), _round_up(K, tk_), _round_up(N, tn_)

    xp = _pad2(x.astype(jnp.bfloat16), Mp, Kp)
    wp = _pad2(w.astype(jnp.bfloat16), Kp, Np)
    inputs = [xp, wp]
    in_specs = [pl.BlockSpec((tm_, tk_), lambda i, j, k: (i, k)),
                pl.BlockSpec((tk_, tn_), lambda i, j, k: (k, j))]

    has_bias = b is not None
    if has_bias:
        inputs.append(_pad2(b.reshape(1, N).astype(jnp.float32), 1, Np))
        in_specs.append(pl.BlockSpec((1, tn_), lambda i, j, k: (0, j)))
    has_res = residual is not None
    if has_res:
        inputs.append(_pad2(residual.astype(jnp.float32), Mp, Np))
        in_specs.append(pl.BlockSpec((tm_, tn_), lambda i, j, k: (i, j)))

    out = pl.pallas_call(
        functools.partial(_linear_kernel, act=act,
                          has_bias=has_bias, has_res=has_res),
        out_shape=jax.ShapeDtypeStruct((Mp, Np), jnp.float32),
        grid=(Mp // tm_, Np // tn_, Kp // tk_),
        in_specs=in_specs,
        out_specs=pl.BlockSpec((tm_, tn_), lambda i, j, k: (i, j)),
        scratch_shapes=[pltpu.VMEM((tm_, tn_), jnp.float32)],
        compiler_params=pltpu.CompilerParams(
            dimension_semantics=("parallel", "parallel", "arbitrary")),
    )(*inputs)
    return out[:M, :N]


# ---------------------- fused LayerNorm + GEMM --------------------------------

def _ln_linear_kernel(*refs, act, eps, has_bias):
    # refs: x, gamma, beta, w, [bias], out
    x_ref, g_ref, bln_ref, w_ref = refs[:4]
    if has_bias:
        b_ref, o_ref = refs[4], refs[5]
    else:
        o_ref = refs[4]

    x = x_ref[...].astype(jnp.float32)
    mu = jnp.mean(x, axis=-1, keepdims=True)
    var = jnp.mean(jnp.square(x - mu), axis=-1, keepdims=True)
    h = (x - mu) * jax.lax.rsqrt(var + eps) * g_ref[...] + bln_ref[...]

    y = jnp.dot(h.astype(jnp.bfloat16), w_ref[...],
                preferred_element_type=jnp.float32)
    if has_bias:
        y = y + b_ref[...]
    if act == "quick_gelu":
        y = y * jax.nn.sigmoid(1.702 * y)
    o_ref[...] = y


def ln_linear(x, g, bln, w, b=None, act=None, eps=1e-5, tm=256, tn=256):
    """LayerNorm(x) @ w (+ bias, + act), fused.  K (=D) is kept untiled so the
    in-kernel LN statistics are exact; M/N are tiled & parallel."""
    M, K = x.shape
    N = w.shape[1]
    tm_ = min(tm, _round_up(M, 8))
    tn_ = min(tn, _round_up(N, 128))
    Mp, Np = _round_up(M, tm_), _round_up(N, tn_)

    xp = _pad2(x.astype(jnp.float32), Mp, K)          # never pad K (LN stats)
    wp = _pad2(w.astype(jnp.bfloat16), K, Np)
    inputs = [xp, g.reshape(1, K).astype(jnp.float32),
              bln.reshape(1, K).astype(jnp.float32), wp]
    in_specs = [pl.BlockSpec((tm_, K), lambda i, j: (i, 0)),
                pl.BlockSpec((1, K), lambda i, j: (0, 0)),
                pl.BlockSpec((1, K), lambda i, j: (0, 0)),
                pl.BlockSpec((K, tn_), lambda i, j: (0, j))]
    has_bias = b is not None
    if has_bias:
        inputs.append(_pad2(b.reshape(1, N).astype(jnp.float32), 1, Np))
        in_specs.append(pl.BlockSpec((1, tn_), lambda i, j: (0, j)))

    out = pl.pallas_call(
        functools.partial(_ln_linear_kernel, act=act, eps=eps,
                          has_bias=has_bias),
        out_shape=jax.ShapeDtypeStruct((Mp, Np), jnp.float32),
        grid=(Mp // tm_, Np // tn_),
        in_specs=in_specs,
        out_specs=pl.BlockSpec((tm_, tn_), lambda i, j: (i, j)),
        compiler_params=pltpu.CompilerParams(
            dimension_semantics=("parallel", "parallel")),
    )(*inputs)
    return out[:M, :N]


# --------------------------- standalone LayerNorm ------------------------------

def _layernorm_kernel(x_ref, g_ref, b_ref, o_ref, *, eps):
    x = x_ref[...].astype(jnp.float32)
    mu = jnp.mean(x, axis=-1, keepdims=True)
    var = jnp.mean(jnp.square(x - mu), axis=-1, keepdims=True)
    o_ref[...] = (x - mu) * jax.lax.rsqrt(var + eps) * g_ref[...] + b_ref[...]


def layernorm(x, g, b, eps=1e-5, tm=512):
    M, D = x.shape
    tm_ = min(tm, _round_up(M, 8))
    Mp = _round_up(M, tm_)
    xp = _pad2(x.astype(jnp.float32), Mp, D)
    out = pl.pallas_call(
        functools.partial(_layernorm_kernel, eps=eps),
        out_shape=jax.ShapeDtypeStruct((Mp, D), jnp.float32),
        grid=(Mp // tm_,),
        in_specs=[pl.BlockSpec((tm_, D), lambda i: (i, 0)),
                  pl.BlockSpec((1, D), lambda i: (0, 0)),
                  pl.BlockSpec((1, D), lambda i: (0, 0))],
        out_specs=pl.BlockSpec((tm_, D), lambda i: (i, 0)),
        compiler_params=pltpu.CompilerParams(dimension_semantics=("parallel",)),
    )(xp, g.reshape(1, D), b.reshape(1, D))
    return out[:M]


# ------------------------------- attention -------------------------------------

def _attn_kernel(*refs, scale, has_bias):
    if has_bias:
        q_ref, k_ref, v_ref, bias_ref, o_ref = refs
    else:
        q_ref, k_ref, v_ref, o_ref = refs
    q = q_ref[0]                                    # bf16 [H, S, Dh]
    k = k_ref[0]
    v = v_ref[0]
    s = jnp.einsum('hqd,hkd->hqk', q, k,
                   preferred_element_type=jnp.float32) * scale
    if has_bias:
        s = s + bias_ref[0][None, :, :]             # bias broadcast over heads
    s = s - jnp.max(s, axis=-1, keepdims=True)
    p = jnp.exp(s)
    p = p * pl.reciprocal(jnp.sum(p, axis=-1, keepdims=True), approx=True)
    o_ref[0] = jnp.einsum('hqk,hkd->hqd', p.astype(jnp.bfloat16), v,
                          preferred_element_type=jnp.float32)


def attention(q, k, v, bias, scale):
    """q,k,v: [B, H, S, Dh]; bias: [B, S, S] additive or None -> [B,H,S,Dh] f32.

    One grid step per batch element with all heads in-kernel so the MXU sees a
    full batched contraction; no zero-bias DMA when bias is None.
    """
    B, H, S, Dh = q.shape
    inputs = [q.astype(jnp.bfloat16), k.astype(jnp.bfloat16),
              v.astype(jnp.bfloat16)]
    in_specs = [pl.BlockSpec((1, H, S, Dh), lambda i: (i, 0, 0, 0))] * 3
    has_bias = bias is not None
    if has_bias:
        inputs.append(bias.astype(jnp.float32))
        in_specs = in_specs + [pl.BlockSpec((1, S, S), lambda i: (i, 0, 0))]
    return pl.pallas_call(
        functools.partial(_attn_kernel, scale=scale, has_bias=has_bias),
        out_shape=jax.ShapeDtypeStruct((B, H, S, Dh), jnp.float32),
        grid=(B,),
        in_specs=in_specs,
        out_specs=pl.BlockSpec((1, H, S, Dh), lambda i: (i, 0, 0, 0)),
        compiler_params=pltpu.CompilerParams(dimension_semantics=("parallel",)),
    )(*inputs)


# ------------------------- feature normalisation / pooling ---------------------

def _l2norm_kernel(x_ref, o_ref, *, eps):
    x = x_ref[...].astype(jnp.float32)
    o_ref[...] = x * jax.lax.rsqrt(jnp.sum(x * x, axis=-1, keepdims=True) + eps)


def l2_normalize(x, eps=1e-12, tm=512):
    M, D = x.shape
    tm_ = min(tm, _round_up(M, 8))
    Mp = _round_up(M, tm_)
    xp = _pad2(x.astype(jnp.float32), Mp, D)
    out = pl.pallas_call(
        functools.partial(_l2norm_kernel, eps=eps),
        out_shape=jax.ShapeDtypeStruct((Mp, D), jnp.float32),
        grid=(Mp // tm_,),
        in_specs=[pl.BlockSpec((tm_, D), lambda i: (i, 0))],
        out_specs=pl.BlockSpec((tm_, D), lambda i: (i, 0)),
        compiler_params=pltpu.CompilerParams(dimension_semantics=("parallel",)),
    )(xp)
    return out[:M]


def _vis_pool_kernel(x_ref, o_ref, *, eps):
    # per-frame normalize -> mean over frames -> normalize  (VidCLIP semantics)
    x = x_ref[...].astype(jnp.float32)                       # [B, N, P]
    x = x * jax.lax.rsqrt(jnp.sum(x * x, axis=-1, keepdims=True) + eps)
    m = jnp.mean(x, axis=1)                                  # [B, P]
    o_ref[...] = m * jax.lax.rsqrt(jnp.sum(m * m, axis=-1, keepdims=True) + eps)


def vis_pool(x, eps=1e-12):
    B, N, P = x.shape
    return pl.pallas_call(
        functools.partial(_vis_pool_kernel, eps=eps),
        out_shape=jax.ShapeDtypeStruct((B, P), jnp.float32),
        grid=(1,),
        in_specs=[pl.BlockSpec((B, N, P), lambda i: (0, 0, 0))],
        out_specs=pl.BlockSpec((B, P), lambda i: (0, 0)),
    )(x.astype(jnp.float32))


# ---------------------------- CLIP model pieces ---------------------------------

def clip_encoder_layer(x, lp, heads, attn_bias):
    """Pre-LN transformer block (HF CLIPEncoderLayer).  x: [M, S, D] float32."""
    M, S, D = x.shape
    Dh = D // heads
    scale = Dh ** -0.5
    x2 = x.reshape(M * S, D)

    # LN1 + fused QKV projection
    qkv = ln_linear(x2, lp["ln1_g"], lp["ln1_b"], lp["qkv_w"], lp["qkv_b"])
    qkv = qkv.reshape(M, S, 3, heads, Dh).transpose(2, 0, 3, 1, 4)  # [3,M,H,S,Dh]
    q, k, v = qkv[0], qkv[1], qkv[2]

    o = attention(q, k, v, attn_bias, scale)                 # [M, H, S, Dh]
    o = o.transpose(0, 2, 1, 3).reshape(M * S, D)
    x2 = linear(o, lp["o_w"], lp["o_b"], residual=x2)        # residual fused

    # LN2 + fused fc1 (+quick_gelu), then fc2 with fused residual
    h = ln_linear(x2, lp["ln2_g"], lp["ln2_b"],
                  lp["fc1_w"], lp["fc1_b"], act="quick_gelu")
    x2 = linear(h, lp["fc2_w"], lp["fc2_b"], residual=x2)
    return x2.reshape(M, S, D)


def vision_forward(pixel, vp, cfg):
    """HF CLIPVisionTransformer; returns pooled (post-LN CLS) [M, D]."""
    M, C, H, W = pixel.shape
    p = cfg["patch"]
    D = cfg["v_dim"]
    gh, gw = H // p, W // p
    n_patch = gh * gw
    # unfold NCHW into patch rows [M*n_patch, C*p*p] (matches conv weight flatten)
    patches = (pixel.reshape(M, C, gh, p, gw, p)
                    .transpose(0, 2, 4, 1, 3, 5)
                    .reshape(M * n_patch, C * p * p))
    x = linear(patches, vp["patch_w"])                 # conv2d (bias=False) as matmul
    x = x.reshape(M, n_patch, D)
    cls = jnp.broadcast_to(vp["class_emb"].reshape(1, 1, D).astype(jnp.float32),
                           (M, 1, D))
    x = jnp.concatenate([cls, x], axis=1)              # [M, S, D]
    S = n_patch + 1
    x = x + vp["pos_emb"][None, :, :].astype(jnp.float32)
    x = layernorm(x.reshape(M * S, D), vp["pre_ln_g"], vp["pre_ln_b"]).reshape(M, S, D)
    for lp in vp["layers"]:
        x = clip_encoder_layer(x, lp, cfg["v_heads"], attn_bias=None)
    pooled = layernorm(x[:, 0, :], vp["post_ln_g"], vp["post_ln_b"])  # CLS token
    return pooled


def text_forward(ids, mask, tp, cfg):
    """HF CLIPTextTransformer; returns pooled (EOS = argmax id position) [B, D]."""
    B, L = ids.shape
    D = cfg["t_dim"]
    heads = cfg["t_heads"]
    x = (tp["tok_emb"][ids].astype(jnp.float32)
         + tp["pos_emb"][None, :L, :].astype(jnp.float32))
    # causal AND key-padding mask applied once with a single finite value
    causal = jnp.tril(jnp.ones((L, L), dtype=bool))
    allowed = causal[None, :, :] & mask.astype(bool)[:, None, :]
    bias = jnp.where(allowed, 0.0, -1e9).astype(jnp.float32)          # [B, L, L]
    for lp in tp["layers"]:
        x = clip_encoder_layer(x, lp, heads, bias)
    x = layernorm(x.reshape(B * L, D), tp["final_ln_g"], tp["final_ln_b"]).reshape(B, L, D)
    eos_idx = jnp.argmax(ids, axis=-1)
    pooled = x[jnp.arange(B), eos_idx]
    return pooled


def vidclip_forward(params, video, text_input_ids, text_input_mask):
    """Non-ViP path of VidCLIP.forward (image/caption args omitted)."""
    cfg = params["cfg"]
    B, N, C, H, W = video.shape
    pixel = video.reshape(B * N, C, H, W)

    # --- text tower: text_model -> text_projection -> L2-norm (CLIPModel.text_embeds)
    t_pooled = text_forward(text_input_ids, text_input_mask, params["text"], cfg)
    text_embeds = linear(t_pooled, params["text_proj_w"])          # no bias
    text_features = l2_normalize(text_embeds)

    # --- vision tower: vision_model pooled -> visual_projection -> norm/mean/norm
    v_pooled = vision_forward(pixel, params["vision"], cfg)        # [B*N, D]
    vis = linear(v_pooled, params["visual_proj_w"])                # [B*N, P]
    vis_features = vis_pool(vis.reshape(B, N, cfg["proj"]))        # [B, P]

    return {"text_features": text_features, "vis_features": vis_features}


# ---------------------------- deterministic init --------------------------------

def init_params(key, cfg):
    def dense(k, kin, kout):
        # matmul weights stored bf16 (MXU-native); biases / LN params stay f32
        return (jax.random.normal(k, (kin, kout), jnp.float32) * 0.02).astype(jnp.bfloat16)

    def enc_layer(k, d, mlp):
        ks = jax.random.split(k, 6)
        qkv_w = jnp.concatenate([dense(ks[0], d, d),
                                 dense(ks[1], d, d),
                                 dense(ks[2], d, d)], axis=1)       # [D, 3D]
        return {
            "ln1_g": jnp.ones((d,), jnp.float32), "ln1_b": jnp.zeros((d,), jnp.float32),
            "qkv_w": qkv_w, "qkv_b": jnp.zeros((3 * d,), jnp.float32),
            "o_w": dense(ks[3], d, d), "o_b": jnp.zeros((d,), jnp.float32),
            "ln2_g": jnp.ones((d,), jnp.float32), "ln2_b": jnp.zeros((d,), jnp.float32),
            "fc1_w": dense(ks[4], d, mlp), "fc1_b": jnp.zeros((mlp,), jnp.float32),
            "fc2_w": dense(ks[5], mlp, d), "fc2_b": jnp.zeros((d,), jnp.float32),
        }

    ks = jax.random.split(key, 16)
    D, Dt, P = cfg["v_dim"], cfg["t_dim"], cfg["proj"]
    C, p = cfg["channels"], cfg["patch"]
    n_patch = (cfg["image"] // p) ** 2
    vision = {
        "patch_w": dense(ks[0], C * p * p, D),
        "class_emb": jax.random.normal(ks[1], (D,), jnp.float32) * 0.02,
        "pos_emb": jax.random.normal(ks[2], (n_patch + 1, D), jnp.float32) * 0.02,
        "pre_ln_g": jnp.ones((D,), jnp.float32), "pre_ln_b": jnp.zeros((D,), jnp.float32),
        "post_ln_g": jnp.ones((D,), jnp.float32), "post_ln_b": jnp.zeros((D,), jnp.float32),
        "layers": [enc_layer(k, D, cfg["v_mlp"])
                   for k in jax.random.split(ks[3], cfg["v_layers"])],
    }
    text = {
        "tok_emb": jax.random.normal(ks[4], (cfg["vocab"], Dt), jnp.float32) * 0.02,
        "pos_emb": jax.random.normal(ks[5], (cfg["max_len"], Dt), jnp.float32) * 0.02,
        "final_ln_g": jnp.ones((Dt,), jnp.float32), "final_ln_b": jnp.zeros((Dt,), jnp.float32),
        "layers": [enc_layer(k, Dt, cfg["t_mlp"])
                   for k in jax.random.split(ks[6], cfg["t_layers"])],
    }
    return {
        "cfg": cfg,
        "vision": vision,
        "text": text,
        "visual_proj_w": dense(ks[7], D, P),
        "text_proj_w": dense(ks[8], Dt, P),
        # logit_scale exists on CLIPModel but is unused in the returned results.
        "logit_scale": jnp.array(4.6, jnp.float32),
    }


# ------------------------------------ main ---------------------------------------

if __name__ == "__main__":
    cfg = dict(patch=8, image=16, channels=3,
               v_dim=32, v_heads=2, v_layers=2, v_mlp=64,
               t_dim=32, t_heads=2, t_layers=2, t_mlp=64,
               vocab=64, max_len=8, proj=16)

    key = jax.random.PRNGKey(0)
    pkey, vkey, ikey = jax.random.split(key, 3)
    params = init_params(pkey, cfg)

    B, N = 2, 2   # batch, n_clips*num_frms
    video = jax.random.normal(
        vkey, (B, N, cfg["channels"], cfg["image"], cfg["image"]), jnp.float32)
    text_input_ids = jax.random.randint(
        ikey, (B, cfg["max_len"]), 1, cfg["vocab"]).astype(jnp.int32)
    text_input_mask = jnp.array([[1, 1, 1, 1, 1, 1, 0, 0],
                                 [1, 1, 1, 1, 1, 1, 1, 1]], jnp.int32)

    out = vidclip_forward(params, video, text_input_ids, text_input_mask)
    out = jax.block_until_ready(out)

    assert out["text_features"].shape == (B, cfg["proj"])
    assert out["vis_features"].shape == (B, cfg["proj"])
    assert bool(jnp.all(jnp.isfinite(out["text_features"])))
    assert bool(jnp.all(jnp.isfinite(out["vis_features"])))
    print("KERNEL_OK")
</pallas_src>

<mosaic_0001>
module attributes {stable_mosaic.version = 11 : i64} {
  func.func @_ln_linear_kernel(%arg0: i32, %arg1: i32, %arg2: memref<16x32xf32, #tpu.memory_space<vmem>>, %arg3: memref<1x32xf32, #tpu.memory_space<vmem>>, %arg4: memref<1x32xf32, #tpu.memory_space<vmem>>, %arg5: memref<32x128xbf16, #tpu.memory_space<vmem>>, %arg6: memref<1x128xf32, #tpu.memory_space<vmem>>, %arg7: memref<16x128xf32, #tpu.memory_space<vmem>>) attributes {dimension_semantics = [#tpu.dimension_semantics<parallel>, #tpu.dimension_semantics<parallel>], iteration_bounds = array<i64: 1, 1>, scalar_prefetch = 0 : i64, scratch_operands = 0 : i64, tpu.core_type = #tpu.core_type<tc>, window_params = [{transform_indices = @transform_0, window_bounds = array<i64: 16, 32>}, {pipeline_mode = #tpu.pipeline_mode<synchronous>, transform_indices = @transform_1, window_bounds = array<i64: 1, 32>}, {pipeline_mode = #tpu.pipeline_mode<synchronous>, transform_indices = @transform_2, window_bounds = array<i64: 1, 32>}, {transform_indices = @transform_3, window_bounds = array<i64: 32, 128>}, {transform_indices = @transform_4, window_bounds = array<i64: 1, 128>}, {transform_indices = @transform_5, window_bounds = array<i64: 16, 128>}]} {
    %c0 = arith.constant 0 : index
    %c0_0 = arith.constant 0 : index
    %0 = vector.load %arg2[%c0, %c0_0] : memref<16x32xf32, #tpu.memory_space<vmem>>, vector<16x32xf32>
    %cst = arith.constant dense<0.000000e+00> : vector<16xf32>
    %1 = vector.multi_reduction <add>, %0, %cst [1] : vector<16x32xf32> to vector<16xf32>
    %2 = vector.shape_cast %1 : vector<16xf32> to vector<16x1xf32>
    %cst_1 = arith.constant 3.200000e+01 : f32
    %3 = vector.broadcast %cst_1 : f32 to vector<16x1xf32>
    %4 = arith.divf %2, %3 : vector<16x1xf32>
    %5 = vector.broadcast %4 : vector<16x1xf32> to vector<16x32xf32>
    %6 = arith.subf %0, %5 : vector<16x32xf32>
    %7 = arith.mulf %6, %6 : vector<16x32xf32>
    %cst_2 = arith.constant dense<0.000000e+00> : vector<16xf32>
    %8 = vector.multi_reduction <add>, %7, %cst_2 [1] : vector<16x32xf32> to vector<16xf32>
    %9 = vector.shape_cast %8 : vector<16xf32> to vector<16x1xf32>
    %cst_3 = arith.constant 3.200000e+01 : f32
    %10 = vector.broadcast %cst_3 : f32 to vector<16x1xf32>
    %11 = arith.divf %9, %10 : vector<16x1xf32>
    %12 = vector.broadcast %4 : vector<16x1xf32> to vector<16x32xf32>
    %13 = arith.subf %0, %12 : vector<16x32xf32>
    %cst_4 = arith.constant 9.99999974E-6 : f32
    %14 = vector.broadcast %cst_4 : f32 to vector<16x1xf32>
    %15 = arith.addf %11, %14 : vector<16x1xf32>
    %16 = math.rsqrt %15 : vector<16x1xf32>
    %17 = vector.broadcast %16 : vector<16x1xf32> to vector<16x32xf32>
    %18 = arith.mulf %13, %17 : vector<16x32xf32>
    %c0_5 = arith.constant 0 : index
    %c0_6 = arith.constant 0 : index
    %19 = vector.load %arg3[%c0_5, %c0_6] : memref<1x32xf32, #tpu.memory_space<vmem>>, vector<1x32xf32>
    %20 = vector.broadcast %19 : vector<1x32xf32> to vector<16x32xf32>
    %21 = arith.mulf %18, %20 : vector<16x32xf32>
    %c0_7 = arith.constant 0 : index
    %c0_8 = arith.constant 0 : index
    %22 = vector.load %arg4[%c0_7, %c0_8] : memref<1x32xf32, #tpu.memory_space<vmem>>, vector<1x32xf32>
    %23 = vector.broadcast %22 : vector<1x32xf32> to vector<16x32xf32>
    %24 = arith.addf %21, %23 : vector<16x32xf32>
    %25 = arith.truncf %24 : vector<16x32xf32> to vector<16x32xbf16>
    %c0_9 = arith.constant 0 : index
    %c0_10 = arith.constant 0 : index
    %26 = vector.load %arg5[%c0_9, %c0_10] : memref<32x128xbf16, #tpu.memory_space<vmem>>, vector<32x128xbf16>
    %cst_11 = arith.constant dense<0.000000e+00> : vector<16x128xf32>
    %27 = tpu.matmul %25, %26, %cst_11 {dimension_numbers = #tpu.dot_dimension_numbers<[1], [0], [0], [1], [0, 0, 1, 1], [], []>} : vector<16x32xbf16>, vector<32x128xbf16>, vector<16x128xf32> -> vector<16x128xf32>
    %c0_12 = arith.constant 0 : index
    %c0_13 = arith.constant 0 : index
    %28 = vector.load %arg6[%c0_12, %c0_13] : memref<1x128xf32, #tpu.memory_space<vmem>>, vector<1x128xf32>
    %29 = vector.broadcast %28 : vector<1x128xf32> to vector<16x128xf32>
    %30 = arith.addf %27, %29 : vector<16x128xf32>
    %c0_14 = arith.constant 0 : index
    %c0_15 = arith.constant 0 : index
    %31 = vector.load %arg7[%c0_14, %c0_15] : memref<16x128xf32, #tpu.memory_space<vmem>>, vector<16x128xf32>
    tpu.vector_store %arg7[%c0_14, %c0_15], %30 {strides = array<i32>} : memref<16x128xf32, #tpu.memory_space<vmem>>, vector<16x128xf32>,
    return
  }
  func.func @transform_0(%arg0: i32, %arg1: i32) -> (i32, i32) {
    %c0_i32 = arith.constant 0 : i32
    %c0_i32_0 = arith.constant 0 : i32
    return %arg0, %c0_i32 : i32, i32
  }
  func.func @transform_1(%arg0: i32, %arg1: i32) -> (i32, i32) {
    %c0_i32 = arith.constant 0 : i32
    %c0_i32_0 = arith.constant 0 : i32
    %c0_i32_1 = arith.constant 0 : i32
    return %c0_i32, %c0_i32_0 : i32, i32
  }
  func.func @transform_2(%arg0: i32, %arg1: i32) -> (i32, i32) {
    %c0_i32 = arith.constant 0 : i32
    %c0_i32_0 = arith.constant 0 : i32
    %c0_i32_1 = arith.constant 0 : i32
    return %c0_i32, %c0_i32_0 : i32, i32
  }
  func.func @transform_3(%arg0: i32, %arg1: i32) -> (i32, i32) {
    %c0_i32 = arith.constant 0 : i32
    %c0_i32_0 = arith.constant 0 : i32
    return %c0_i32, %arg1 : i32, i32
  }
  func.func @transform_4(%arg0: i32, %arg1: i32) -> (i32, i32) {
    %c0_i32 = arith.constant 0 : i32
    %c0_i32_0 = arith.constant 0 : i32
    return %c0_i32, %arg1 : i32, i32
  }
  func.func @transform_5(%arg0: i32, %arg1: i32) -> (i32, i32) {
    %c0_i32 = arith.constant 0 : i32
    return %arg0, %arg1 : i32, i32
  }
}

</mosaic_0001>

<bundles_post_ra>
// kernel: tpu_custom_call.1
= control target key start
LH: loop header
LB: loop body
LE: loop exit
PB: predicated region body
PF: predicated region fallthrough
CT: control target
= control target key end

     0   :  { %10 = vsyncpa [#allocation3], 0  ;;  %s385_s0 = inlined_call_operand.hbm [shape: f32[16,32], index: 0, kind: input, shape index: {}]   ;;  %s386_s1 = inlined_call_operand.vmem [shape: f32[1,32], index: 1, kind: input, shape index: {}]   ;;  %s387_s2 = inlined_call_operand.vmem [shape: f32[1,32], index: 2, kind: input, shape index: {}]   ;;  %s388_s3 = inlined_call_operand.hbm [shape: bf16[32,128], index: 3, kind: input, shape index: {}]   ;;  %s389_s4 = inlined_call_operand.vmem [shape: f32[1,128], index: 4, kind: input, shape index: {}]   ;;  %s390_s5 = inlined_call_operand.hbm [shape: f32[16,128], index: 5, kind: output, shape index: {}]  }
   0x1   :  { %11 = vsyncpa [#allocation6], 0 }
   0x2   :  { %12 = vsyncpa [#allocation4], 0  ;;  %s290_s18 = smov [#allocation2]   ;;  %s218_s22 = scalar_lea.hbm %s385_s0, 256 }
   0x3   :  { %s18_s19 = sshll.u32 %s290_s18, 4  ;;  %p219_p0 = scmp.ne.s32.totalorder %s385_s0, %s218_s22  ;;  %s19_s19 = int_to_ptr.vmem [resolvable:$true] %s18_s19 }
   0x4   :  { %p222_p1 = scmp.lt.u32.totalorder %s218_s22, %s385_s0 }
   0x6   :  { %p224_p2 = pnand %p222_p1, %p219_p0 }
   0x8   :  { %227 = shalt.err (!%p224_p2)
}
   0x9   :  { %s228_s27 = scalar_lea.vmem %s19_s19, 256  ;;  %p233_p4 = scmp.lt.s32.totalorder %s19_s19, %s19_s19 }
   0xa   :  { %p229_p3 = scmp.ne.s32.totalorder %s19_s19, %s228_s27  ;;  %p234_p5 = scmp.lt.s32.totalorder %s228_s27, %s228_s27 }
   0xc   :  { %p235_p6 = por %p234_p5, %p233_p4 }
   0xe   :  { %p236_p7 = pnand %p235_p6, %p229_p3 }
  0x10   :  { %239 = shalt.err (!%p236_p7)
}
  0x11   :  { %s291_s28 = smov 128   ;;  %s292_s29 = smov 8  }
  0x12   :  { %24 = dma.hbm_to_vmem [thread:$0]  %s385_s0, 256, %s19_s19, [#allocation3], %s291_s28, %s291_s28, %s292_s29  }
  0x13   :  { %s293_s7 = smov [#allocation5]   ;;  %s240_s11 = scalar_lea.hbm %s388_s3, 256 }
  0x14   :  { %s34_s8 = sshll.u32 %s293_s7, 4  ;;  %p241_p8 = scmp.ne.s32.totalorder %s388_s3, %s240_s11  ;;  %s35_s8 = int_to_ptr.vmem [resolvable:$true] %s34_s8 }
  0x15   :  { %p244_p9 = scmp.lt.u32.totalorder %s240_s11, %s388_s3 }
  0x17   :  { %p246_p10 = pnand %p244_p9, %p241_p8 }
  0x19   :  { %249 = shalt.err (!%p246_p10)
}
  0x1a   :  { %s250_s16 = scalar_lea.vmem %s35_s8, 256  ;;  %p255_p12 = scmp.lt.s32.totalorder %s35_s8, %s35_s8 }
  0x1b   :  { %p251_p11 = scmp.ne.s32.totalorder %s35_s8, %s250_s16  ;;  %p256_p13 = scmp.lt.s32.totalorder %s250_s16, %s250_s16 }
  0x1d   :  { %p257_p0 = por %p256_p13, %p255_p12 }
  0x1f   :  { %p258_p1 = pnand %p257_p0, %p251_p11 }
  0x21   :  { %261 = shalt.err (!%p258_p1)
}
  0x22   :  { %s294_s0 = smov 64   ;;  %s295_s17 = smov 4  }
  0x23   :  { %40 = dma.hbm_to_vmem [thread:$0]  %s388_s3, 256, %s35_s8, [#allocation6], %s294_s0, %s294_s0, %s295_s17  }
  0x24   :  { %284 = dma.done.wait [#allocation3], 256  }
  0x25   :  { %285 = vsyncadd [#allocation3], 4294967040 }
  0x26   :  { %286 = dma.done.wait [#allocation6], 256  }
  0x27   :  { %287 = vsyncadd [#allocation6], 4294967040  ;;  %vm52_vm0 = vcmask 261120   ;;  %v50_v0 = vld [vmem:[#allocation2] sm:$0xff]  ;;  %v51_v1 = vld [vmem:[#allocation2 + $0x8] sm:$0xff]  ;;  %v296_v15 = vmov 0.0  }
  0x28   :  { %v53_v2 = vsel %vm52_vm0, %v50_v0, 0.0  ;;  %v56_v3 = vsel %vm52_vm0, %v51_v1, 0.0  ;;  %v212_v14 = vld [vmem:[#allocation5] sm:$0xff]   ;;  %195 = vmatprep.subr.bf16.mxu0 %v296_v15  ;;  %v213_v16 = vld [vmem:[#allocation5 + $0x8] sm:$0xff]   ;;  %vm297_vm1 = vmmov 0   ;;  %s298_s25 = smov [#allocation7]  }
  0x29   :  { %54 = vadd.xlane.f32.xlu0 %v53_v2  ;;  %196 = vmatpush3.bf16.msra.mxu0 %v212_v14  ;;  %v186_v25 = vld [vmem:[%s386_s1] ss:$0 sm:$0xff]  ;;  %s173_s1 = sshll.u32 %s298_s25, 4  ;;  %s174_s1 = int_to_ptr.vmem [resolvable:$true] %s173_s1 }
  0x2a   :  { %199 = vmatprep.mubr.msk.bf16.mxu0 %vm297_vm1, %v296_v15  ;;  %197 = vmatprep.subr.bf16.mxu0 %v296_v15  ;;  %v187_v29 = vld [vmem:[%s387_s2] ss:$0 sm:$0xff]  ;;  %s262_s2 = scalar_lea.vmem %s174_s1, 256  ;;  %p267_p3 = scmp.lt.s32.totalorder %s174_s1, %s174_s1 }
  0x2b   :  { %v188_v34 = vld [vmem:[%s389_s4] ss:$0 sm:$0xff]  ;;  %p263_p2 = scmp.ne.s32.totalorder %s174_s1, %s262_s2  ;;  %p268_p4 = scmp.lt.s32.totalorder %s262_s2, %s262_s2 }
  0x2d   :  { %57 = vadd.xlane.f32.xlu0 %v56_v3  ;;  %198 = vmatpush3.bf16.msra.mxu0 %v213_v16  ;;  %p269_p5 = por %p268_p4, %p267_p3 }
  0x2f   :  { %p270_p6 = pnand %p269_p5, %p263_p2 }
  0xb6   :  { %v55_v4 = vpop.xlane.xlu0 %54 }
  0xb7   :  { %v60_v5 = vmul.f32 0.03125, %v55_v4 }
  0xb9   :  { %v62_v6 = vsub.f32 %v50_v0, %v60_v5 }
  0xba   :  { %v58_v7 = vpop.xlane.xlu0 %57 }
  0xbb   :  { %v61_v8 = vmul.f32 0.03125, %v58_v7  ;;  %v64_v9 = vmul.f32 %v62_v6, %v62_v6 }
  0xbd   :  { %v63_v10 = vsub.f32 %v51_v1, %v61_v8  ;;  %v66_v11 = vsel %vm52_vm0, %v64_v9, 0.0 }
  0xbe   :  { %67 = vadd.xlane.f32.xlu1 %v66_v11 }
  0xbf   :  { %v65_v12 = vmul.f32 %v63_v10, %v63_v10 }
  0xc1   :  { %v69_v13 = vsel %vm52_vm0, %v65_v12, 0.0 }
  0xc2   :  { %70 = vadd.xlane.f32.xlu1 %v69_v13 }
 0x14b   :  { %v68_v17 = vpop.xlane.xlu1 %67 }
 0x14c   :  { %v72_v18 = vmul.f32 0.03125, %v68_v17 }
 0x14e   :  { %v74_v19 = vadd.f32 1e-05, %v72_v18 }
 0x14f   :  { %v71_v20 = vpop.xlane.xlu1 %70 }
 0x150   :  { %214 = vrsqrt.f32 %v74_v19  ;;  %v73_v21 = vmul.f32 0.03125, %v71_v20 }
 0x152   :  { %v75_v22 = vadd.f32 1e-05, %v73_v21 }
 0x154   :  { %216 = vrsqrt.f32 %v75_v22 }
 0x15a   :  { %v215_v23 = vpop.eup %214 }
 0x15b   :  { %v78_v24 = vmul.f32 %v215_v23, %v62_v6 }
 0x15d   :  { %v87_v28 = vmul.f32 %v186_v25, %v78_v24 }
 0x15e   :  { %v217_v26 = vpop.eup %216 }
 0x15f   :  { %v79_v27 = vmul.f32 %v217_v26, %v63_v10  ;;  %v96_v31 = vadd.f32 %v187_v29, %v87_v28 }
 0x161   :  { %v88_v30 = vmul.f32 %v186_v25, %v79_v27 }
 0x163   :  { %v97_v32 = vadd.f32 %v187_v29, %v88_v30 }
 0x165   :  { %v98_v33 = vpack.c.bf16 %v97_v32, %v96_v31 }
 0x167   :  { %200 = vmatmul.mubr.msk.bf16.vlgmr.msra.gmra.mrb[0].mxu0 %vm52_vm0, %v98_v33 }
 0x23a   :  { %v159_v35 = vpop.f32.mrb[0].mxu0 }
 0x23b   :  { %v160_v36 = vadd.f32 %v188_v34, %v159_v35  ;;  %v201_v37 = vpop.f32.mrb[1].mxu0 }
 0x23c   :  { %v162_v38 = vpop.f32.mrb[2].mxu0 }
 0x23d   :  { %166 = vst [vmem:[#allocation7] sm:$0xff] %v160_v36  ;;  %v163_v39 = vadd.f32 %v188_v34, %v162_v38  ;;  %v202_v40 = vpop.f32.mrb[3].mxu0 }
 0x23f   :  { %167 = vst [vmem:[#allocation7 + $0x8] sm:$0xff] %v163_v39 }
 0x240   :  { %273 = shalt.err (!%p270_p6)
}
 0x241   :  { %s274_s27 = scalar_lea.hbm %s390_s5, 256 }
 0x242   :  { %p275_p7 = scmp.ne.s32.totalorder %s390_s5, %s274_s27  ;;  %p278_p8 = scmp.lt.u32.totalorder %s274_s27, %s390_s5 }
 0x244   :  { %p280_p9 = pnand %p278_p8, %p275_p7 }
 0x246   :  { %283 = shalt.err (!%p280_p9)
}
 0x247   :  { %179 = dma.vmem_to_hbm [thread:$0]  %s174_s1, 256, %s390_s5, [#allocation4], %s291_s28, %s291_s28, %s292_s29  }
 0x248   :  { %288 = dma.done.wait [#allocation4], 256  }
 0x249   :  { %289 = vsyncadd [#allocation4], 4294967040 }
 0x24a   :  { %183 = vsyncpa [#allocation3], 1 }
 0x24b   :  { %184 = vsyncpa [#allocation6], 1 }
 0x24c   :  { %185 = vsyncpa [#allocation4], 1 }

</bundles_post_ra>
